<compile_context>
chip_gen: v6e
topology: v6e:2x2x1
jax: 0.10.0
libtpu: 0.0.40
codegen_flags: <defaults>
</compile_context>

<pallas_src>
import functools

import jax
import jax.numpy as jnp
from jax import lax
from jax.experimental import pallas as pl
from jax.experimental.pallas import tpu as pltpu


# ---------------------------------------------------------------------------
# Kernel
# ---------------------------------------------------------------------------
def _self_attention_kernel(x_slab_ref, x_tile_ref, w_ref, b_ref, gamma_ref,
                           o_ref, qt_sc, k_sc, v_sc, *, approx_recip):
    qi = pl.program_id(1)
    cdt = w_ref.dtype                    # MXU input dtype (f32 or bf16)
    n_q, tq, cqp = qt_sc.shape
    c = o_ref.shape[1]

    # ---- Fused Q/K/V (+ ones row) projection, once per batch, resident. ----
    @pl.when(qi == 0)
    def _():
        x_full = x_slab_ref[0].astype(cdt)                          # (C, N)
        proj = jnp.dot(w_ref[...], x_full,
                       preferred_element_type=jnp.float32)          # (Ct, N)
        proj = proj + b_ref[...]                                     # f32
        # Q^T, tiled along the query axis so per-tile reads are leading-index.
        qt = jnp.transpose(proj[0:cqp, :])                           # (N, Cqp)
        qt_sc[...] = qt.reshape(n_q, tq, cqp).astype(qt_sc.dtype)
        # K stays channel-major: energy is then a standard matmul per tile.
        k_sc[...] = proj[cqp:2 * cqp, :].astype(k_sc.dtype)          # (Cqp, N)
        # [V ; ones]: the ones row (zero weights, bias 1.0) makes the PV
        # matmul also produce the softmax row-sums as its last output row.
        v_sc[...] = proj[2 * cqp:, :].astype(v_sc.dtype)             # (C+1, N)

    # ---- One query tile. ----
    q_tile = qt_sc[qi]                                               # (TQ, Cqp)
    energy = jnp.dot(q_tile, k_sc[...],
                     preferred_element_type=jnp.float32)             # (TQ, N)

    m = jnp.max(energy, axis=-1, keepdims=True)                      # lane max
    p = jnp.exp(energy - m)                                          # (TQ, N) f32

    # Fused PV + row-sum: contracts the last dims of [V;1] (C+1, N) and
    # p (TQ, N) -> (C+1, TQ); last row holds the softmax denominators.
    pv = lax.dot_general(v_sc[...], p.astype(cdt),
                         (((1,), (1,)), ((), ())),
                         preferred_element_type=jnp.float32)         # (C+1, TQ)
    out = pv[:c, :] * pl.reciprocal(pv[c:c + 1, :], approx=approx_recip)

    gamma = gamma_ref[0]                                             # SMEM scalar
    o_ref[0] = (gamma * out + x_tile_ref[0]).astype(o_ref.dtype)     # (C, TQ)


# ---------------------------------------------------------------------------
# Wrapper helpers
# ---------------------------------------------------------------------------
def _pad(v, m):
    return -(-v // m) * m


def _vmem_capacity_bytes():
    try:
        return int(pltpu.get_tpu_info().vmem_capacity_bytes)
    except Exception:
        return 64 * 1024 * 1024          # conservative (v7x per-core VMEM)


def _vmem_estimate(C, N, tq, Ct, cqp, cbytes):
    f32 = 4
    n_q = max(N // tq, 1)
    slab = _pad(C, 8) * _pad(N, 128) * f32 * 2            # x projection slab
    xtile = _pad(C, 8) * _pad(tq, 128) * f32 * 2          # residual tiles
    otile = _pad(C, 8) * _pad(tq, 128) * f32 * 2          # output tiles
    wgt = _pad(Ct, 8) * _pad(C, 128) * cbytes             # Buffered(1)
    bias = _pad(Ct, 8) * 128 * f32
    qsc = n_q * _pad(tq, 8) * _pad(cqp, 128) * cbytes     # resident Q^T
    ksc = _pad(cqp, 8) * _pad(N, 128) * cbytes            # resident K
    vsc = _pad(C + 1, 8) * _pad(N, 128) * cbytes          # resident [V ; 1]
    tmp = _pad(tq, 8) * _pad(N, 128) * (2 * f32 + cbytes)  # energy / p temporaries
    return slab + xtile + otile + wgt + bias + qsc + ksc + vsc + tmp


def _block_spec(shape, index_map, buffers=None):
    if buffers is None:
        return pl.BlockSpec(shape, index_map)
    try:
        return pl.BlockSpec(shape, index_map, pipeline_mode=pl.Buffered(buffers))
    except TypeError:     # older API without pipeline_mode: fall back cleanly
        return pl.BlockSpec(shape, index_map)


# ---------------------------------------------------------------------------
# Public entry point
# ---------------------------------------------------------------------------
def self_attention_block(x_nchw, wq, bq, wk, bk, wv, bv, gamma, *,
                         tq=None, mxu_dtype=jnp.bfloat16, approx_recip=None):
    """SelfAttentionBlock forward.

    x_nchw: (B, C, H, W) f32.  wq/wk: (C//8, C), wv: (C, C) (1x1-conv weights
    with the trailing 1x1 squeezed), biases 1-D, gamma scalar.  mxu_dtype
    selects the matmul-input precision (f32 = faithful to the PyTorch module,
    bf16 = v5e/v6e/v7x MXU throughput); softmax and accumulation stay f32.
    """
    B, C, H, W = x_nchw.shape
    N = H * W
    assert C >= 8, "in_channels must be >= 8 (module uses in_channels // 8)"
    Cq = C // 8
    assert wq.shape == (Cq, C) and wk.shape == (Cq, C) and wv.shape == (C, C)

    cqp = max(8, _pad(Cq, 8))            # Q/K rows padded to a sublane multiple
    Ct = 2 * cqp + C + 1                 # [Q ; K ; V ; ones]
    cbytes = jnp.dtype(mxu_dtype).itemsize
    if approx_recip is None:
        approx_recip = jnp.dtype(mxu_dtype) != jnp.dtype(jnp.float32)

    # ---- Chip-VMEM-aware query-tile size. ----
    cap = _vmem_capacity_bytes()
    if tq is None:
        if N % 128 != 0 or N <= 512:
            tq = N                       # single full-extent query tile
        else:
            cands = [t for t in (1024, 512, 256, 128) if N % t == 0]
            tq = next((t for t in cands
                       if _vmem_estimate(C, N, t, Ct, cqp, cbytes) <= 0.55 * cap),
                      cands[-1])
    assert N % tq == 0 and (tq % 128 == 0 or tq == N), (N, tq)
    n_q = N // tq

    # ---- Operands (NCHW -> (B, C, N) is a free reshape, no transpose). ----
    x_bcn = x_nchw.reshape(B, C, N).astype(jnp.float32)

    w_all = jnp.zeros((Ct, C), jnp.float32)
    w_all = w_all.at[0:Cq].set(jnp.asarray(wq, jnp.float32))
    w_all = w_all.at[cqp:cqp + Cq].set(jnp.asarray(wk, jnp.float32))
    w_all = w_all.at[2 * cqp:2 * cqp + C].set(jnp.asarray(wv, jnp.float32))
    b_all = jnp.zeros((Ct,), jnp.float32)
    b_all = b_all.at[0:Cq].set(jnp.asarray(bq, jnp.float32))
    b_all = b_all.at[cqp:cqp + Cq].set(jnp.asarray(bk, jnp.float32))
    b_all = b_all.at[2 * cqp:2 * cqp + C].set(jnp.asarray(bv, jnp.float32))
    b_all = b_all.at[2 * cqp + C].set(1.0)        # ones row (fused row-sum)
    w_all = w_all.astype(mxu_dtype)
    b_all = b_all.reshape(Ct, 1)
    g1 = jnp.asarray(gamma, jnp.float32).reshape(1)

    est = _vmem_estimate(C, N, tq, Ct, cqp, cbytes)
    vmem_limit = int(min(cap, max(est * 5 // 4 + (4 << 20), 32 << 20)))

    slab_bytes = _pad(C, 8) * _pad(N, 128) * 4
    slab_buffers = 1 if slab_bytes * 2 > cap // 4 else None   # save VMEM on big N

    kernel = functools.partial(_self_attention_kernel, approx_recip=approx_recip)

    out_bcn = pl.pallas_call(
        kernel,
        out_shape=jax.ShapeDtypeStruct((B, C, N), jnp.float32),
        grid_spec=pltpu.PrefetchScalarGridSpec(
            num_scalar_prefetch=0,
            grid=(B, n_q),
            in_specs=[
                # Full per-batch slab for the fused projection (constant over
                # the query axis -> DMA'd only when b changes).
                _block_spec((1, C, N), lambda b, q: (b, 0, 0), slab_buffers),
                # Per-tile x block for the residual add (lane-dense DMA).
                pl.BlockSpec((1, C, tq), lambda b, q: (b, 0, q)),
                # Grid-invariant fused weights / bias: single-buffered.
                _block_spec((Ct, C), lambda b, q: (0, 0), 1),
                _block_spec((Ct, 1), lambda b, q: (0, 0), 1),
                pl.BlockSpec(memory_space=pltpu.MemorySpace.SMEM),   # gamma
            ],
            out_specs=pl.BlockSpec((1, C, tq), lambda b, q: (b, 0, q)),
            scratch_shapes=[
                pltpu.VMEM((n_q, tq, cqp), mxu_dtype),   # resident Q^T (tiled)
                pltpu.VMEM((cqp, N), mxu_dtype),         # resident K (channel-major)
                pltpu.VMEM((C + 1, N), mxu_dtype),       # resident [V ; ones]
            ],
        ),
        compiler_params=pltpu.CompilerParams(
            dimension_semantics=("parallel", "arbitrary"),
            vmem_limit_bytes=vmem_limit),
    )(x_bcn, x_bcn, w_all, b_all, g1)

    return out_bcn.reshape(B, C, H, W)


# ---------------------------------------------------------------------------
# Pure-JAX reference (replica of the PyTorch forward, NCHW)
# ---------------------------------------------------------------------------
def _reference(x, wq, bq, wk, bk, wv, bv, gamma):
    B, C, H, W = x.shape
    N = H * W
    xf = x.reshape(B, C, N)
    conv1x1 = lambda w, b: jnp.einsum("oc,bcn->bon", w, xf) + b[None, :, None]
    q = conv1x1(wq, bq)                                   # (B, Cq, N)
    k = conv1x1(wk, bk)                                   # (B, Cq, N)
    v = conv1x1(wv, bv)                                   # (B, C, N)
    energy = jnp.einsum("bci,bcj->bij", q, k)             # (B, N, N)
    attn = jax.nn.softmax(energy, axis=2)
    out = jnp.einsum("bcj,bij->bci", v, attn)             # (B, C, N)
    return gamma * out.reshape(B, C, H, W) + x


if __name__ == "__main__":
    B, C, H, W = 2, 16, 16, 16         # in_channels >= 8 so C // 8 >= 1; N = 256
    Cq = C // 8

    key = jax.random.PRNGKey(0)
    ks = jax.random.split(key, 7)
    x = jax.random.normal(ks[0], (B, C, H, W), jnp.float32)
    wq = jax.random.normal(ks[1], (Cq, C), jnp.float32) * 0.1   # query_conv.weight
    bq = jax.random.normal(ks[2], (Cq,), jnp.float32) * 0.1
    wk = jax.random.normal(ks[3], (Cq, C), jnp.float32) * 0.1   # key_conv.weight
    bk = jax.random.normal(ks[4], (Cq,), jnp.float32) * 0.1
    wv = jax.random.normal(ks[5], (C, C), jnp.float32) * 0.1    # value_conv.weight
    bv = jax.random.normal(ks[6], (C,), jnp.float32) * 0.1
    # nn.Parameter(torch.zeros(1)) in __init__; nonzero so attention is exercised.
    gamma = jnp.float32(0.5)

    ref = _reference(x, wq, bq, wk, bk, wv, bv, gamma)

    # f32 MXU path with explicit query tiling: grid = (2, 2), TQ = 128.
    out = self_attention_block(x, wq, bq, wk, bk, wv, bv, gamma,
                               tq=128, mxu_dtype=jnp.float32)
    out = jax.block_until_ready(out)
    assert out.shape == (B, C, H, W)
    err = float(jnp.max(jnp.abs(out - ref)))
    assert err < 5e-4, f"f32 path mismatch vs reference: {err}"

    # Default (bf16 MXU inputs, f32 softmax/accumulation), auto tq -> full tile.
    out_bf16 = self_attention_block(x, wq, bq, wk, bk, wv, bv, gamma,
                                    mxu_dtype=jnp.bfloat16)
    out_bf16 = jax.block_until_ready(out_bf16)
    err_bf16 = float(jnp.max(jnp.abs(out_bf16 - ref)))
    assert err_bf16 < 3e-2, f"bf16 path mismatch vs reference: {err_bf16}"

    print("KERNEL_OK")
</pallas_src>

<mosaic_0001>
module attributes {stable_mosaic.version = 11 : i64} {
  func.func @_self_attention_kernel(%arg0: i32, %arg1: i32, %arg2: memref<1x16x256xf32, #tpu.memory_space<vmem>>, %arg3: memref<1x16x128xf32, #tpu.memory_space<vmem>>, %arg4: memref<33x16xf32, #tpu.memory_space<vmem>>, %arg5: memref<33x1xf32, #tpu.memory_space<vmem>>, %arg6: memref<1xf32, #tpu.memory_space<smem>>, %arg7: memref<1x16x128xf32, #tpu.memory_space<vmem>>, %arg8: memref<2x128x8xf32, #tpu.memory_space<vmem>>, %arg9: memref<8x256xf32, #tpu.memory_space<vmem>>, %arg10: memref<17x256xf32, #tpu.memory_space<vmem>>) attributes {dimension_semantics = [#tpu.dimension_semantics<parallel>, #tpu.dimension_semantics<arbitrary>], iteration_bounds = array<i64: 2, 2>, scalar_prefetch = 0 : i64, scratch_operands = 3 : i64, tpu.core_type = #tpu.core_type<tc>, window_params = [{transform_indices = @transform_0, window_bounds = array<i64: 1, 16, 256>}, {transform_indices = @transform_1, window_bounds = array<i64: 1, 16, 128>}, {pipeline_mode = #tpu.pipeline_mode<synchronous>, transform_indices = @transform_2, window_bounds = array<i64: 33, 16>}, {pipeline_mode = #tpu.pipeline_mode<synchronous>, transform_indices = @transform_3, window_bounds = array<i64: 33, 1>}, {transform_indices = @transform_4, window_bounds = array<i64: 1>}, {transform_indices = @transform_5, window_bounds = array<i64: 1, 16, 128>}]} {
    %c0_i32 = arith.constant 0 : i32
    %0 = arith.cmpi eq, %arg1, %c0_i32 : i32
    %1 = arith.extui %0 : i1 to i32
    %c0_i32_0 = arith.constant 0 : i32
    %2 = arith.cmpi ne, %1, %c0_i32_0 : i32
    scf.if %2 {
      %c0_15 = arith.constant 0 : index
      %c0_16 = arith.constant 0 : index
      %c0_17 = arith.constant 0 : index
      %29 = vector.load %arg2[%c0_15, %c0_16, %c0_17] : memref<1x16x256xf32, #tpu.memory_space<vmem>>, vector<1x16x256xf32>
      %30 = vector.shape_cast %29 : vector<1x16x256xf32> to vector<16x256xf32>
      %c0_18 = arith.constant 0 : index
      %c0_19 = arith.constant 0 : index
      %31 = vector.load %arg4[%c0_18, %c0_19] : memref<33x16xf32, #tpu.memory_space<vmem>>, vector<33x16xf32>
      %cst_20 = arith.constant dense<0.000000e+00> : vector<33x256xf32>
      %32 = tpu.matmul %31, %30, %cst_20 {dimension_numbers = #tpu.dot_dimension_numbers<[1], [0], [0], [1], [0, 0, 1, 1], [], []>} : vector<33x16xf32>, vector<16x256xf32>, vector<33x256xf32> -> vector<33x256xf32>
      %c0_21 = arith.constant 0 : index
      %c0_22 = arith.constant 0 : index
      %33 = vector.load %arg5[%c0_21, %c0_22] : memref<33x1xf32, #tpu.memory_space<vmem>>, vector<33x1xf32>
      %34 = vector.broadcast %33 : vector<33x1xf32> to vector<33x256xf32>
      %35 = arith.addf %32, %34 : vector<33x256xf32>
      %36 = vector.extract_strided_slice %35 {offsets = [0, 0], sizes = [8, 256], strides = [1, 1]} : vector<33x256xf32> to vector<8x256xf32>
      %37 = tpu.transpose %36, [1, 0] : vector<8x256xf32> -> vector<256x8xf32>
      %38 = vector.shape_cast %37 : vector<256x8xf32> to vector<2x128x8xf32>
      %c0_23 = arith.constant 0 : index
      %c0_24 = arith.constant 0 : index
      %c0_25 = arith.constant 0 : index
      %39 = vector.load %arg8[%c0_23, %c0_24, %c0_25] : memref<2x128x8xf32, #tpu.memory_space<vmem>>, vector<2x128x8xf32>
      tpu.vector_store %arg8[%c0_23, %c0_24, %c0_25], %38 {strides = array<i32>} : memref<2x128x8xf32, #tpu.memory_space<vmem>>, vector<2x128x8xf32>,
      %40 = vector.extract_strided_slice %35 {offsets = [8, 0], sizes = [8, 256], strides = [1, 1]} : vector<33x256xf32> to vector<8x256xf32>
      %c0_26 = arith.constant 0 : index
      %c0_27 = arith.constant 0 : index
      %41 = vector.load %arg9[%c0_26, %c0_27] : memref<8x256xf32, #tpu.memory_space<vmem>>, vector<8x256xf32>
      tpu.vector_store %arg9[%c0_26, %c0_27], %40 {strides = array<i32>} : memref<8x256xf32, #tpu.memory_space<vmem>>, vector<8x256xf32>,
      %42 = vector.extract_strided_slice %35 {offsets = [16, 0], sizes = [17, 256], strides = [1, 1]} : vector<33x256xf32> to vector<17x256xf32>
      %c0_28 = arith.constant 0 : index
      %c0_29 = arith.constant 0 : index
      %43 = vector.load %arg10[%c0_28, %c0_29] : memref<17x256xf32, #tpu.memory_space<vmem>>, vector<17x256xf32>
      tpu.vector_store %arg10[%c0_28, %c0_29], %42 {strides = array<i32>} : memref<17x256xf32, #tpu.memory_space<vmem>>, vector<17x256xf32>,
    } else {
    }
    %3 = arith.index_cast %arg1 : i32 to index
    %c0 = arith.constant 0 : index
    %c0_1 = arith.constant 0 : index
    %4 = vector.load %arg8[%3, %c0, %c0_1] : memref<2x128x8xf32, #tpu.memory_space<vmem>>, vector<1x128x8xf32>
    %5 = vector.shape_cast %4 : vector<1x128x8xf32> to vector<128x8xf32>
    %c0_2 = arith.constant 0 : index
    %c0_3 = arith.constant 0 : index
    %6 = vector.load %arg9[%c0_2, %c0_3] : memref<8x256xf32, #tpu.memory_space<vmem>>, vector<8x256xf32>
    %cst = arith.constant dense<0.000000e+00> : vector<128x256xf32>
    %7 = tpu.matmul %5, %6, %cst {dimension_numbers = #tpu.dot_dimension_numbers<[1], [0], [0], [1], [0, 0, 1, 1], [], []>} : vector<128x8xf32>, vector<8x256xf32>, vector<128x256xf32> -> vector<128x256xf32>
    %cst_4 = arith.constant dense<0xFF800000> : vector<128xf32>
    %8 = vector.multi_reduction <maximumf>, %7, %cst_4 [1] : vector<128x256xf32> to vector<128xf32>
    %9 = vector.shape_cast %8 : vector<128xf32> to vector<128x1xf32>
    %10 = vector.broadcast %9 : vector<128x1xf32> to vector<128x256xf32>
    %11 = arith.subf %7, %10 : vector<128x256xf32>
    %12 = math.exp %11 : vector<128x256xf32>
    %c0_5 = arith.constant 0 : index
    %c0_6 = arith.constant 0 : index
    %13 = vector.load %arg10[%c0_5, %c0_6] : memref<17x256xf32, #tpu.memory_space<vmem>>, vector<17x256xf32>
    %cst_7 = arith.constant dense<0.000000e+00> : vector<17x128xf32>
    %14 = tpu.matmul %13, %12, %cst_7 {dimension_numbers = #tpu.dot_dimension_numbers<[1], [1], [0], [0], [0, 0, 1, 0], [], []>} : vector<17x256xf32>, vector<128x256xf32>, vector<17x128xf32> -> vector<17x128xf32>
    %15 = vector.extract_strided_slice %14 {offsets = [0, 0], sizes = [16, 128], strides = [1, 1]} : vector<17x128xf32> to vector<16x128xf32>
    %16 = vector.extract_strided_slice %14 {offsets = [16, 0], sizes = [1, 128], strides = [1, 1]} : vector<17x128xf32> to vector<1x128xf32>
    %17 = tpu.reciprocal %16 : vector<1x128xf32> -> vector<1x128xf32>
    %18 = vector.broadcast %17 : vector<1x128xf32> to vector<16x128xf32>
    %19 = arith.mulf %15, %18 : vector<16x128xf32>
    %c0_8 = arith.constant 0 : index
    %20 = memref.load %arg6[%c0_8] : memref<1xf32, #tpu.memory_space<smem>>
    %21 = vector.broadcast %20 : f32 to vector<16x128xf32>
    %22 = arith.mulf %21, %19 : vector<16x128xf32>
    %c0_9 = arith.constant 0 : index
    %c0_10 = arith.constant 0 : index
    %c0_11 = arith.constant 0 : index
    %23 = vector.load %arg3[%c0_9, %c0_10, %c0_11] : memref<1x16x128xf32, #tpu.memory_space<vmem>>, vector<1x16x128xf32>
    %24 = vector.shape_cast %23 : vector<1x16x128xf32> to vector<16x128xf32>
    %25 = arith.addf %22, %24 : vector<16x128xf32>
    %c0_12 = arith.constant 0 : index
    %c0_13 = arith.constant 0 : index
    %c0_14 = arith.constant 0 : index
    %26 = vector.load %arg7[%c0_12, %c0_13, %c0_14] : memref<1x16x128xf32, #tpu.memory_space<vmem>>, vector<1x16x128xf32>
    %27 = vector.shape_cast %26 : vector<1x16x128xf32> to vector<16x128xf32>
    %28 = vector.shape_cast %25 : vector<16x128xf32> to vector<1x16x128xf32>
    tpu.vector_store %arg7[%c0_12, %c0_13, %c0_14], %28 {strides = array<i32>} : memref<1x16x128xf32, #tpu.memory_space<vmem>>, vector<1x16x128xf32>,
    return
  }
  func.func @transform_0(%arg0: i32, %arg1: i32) -> (i32, i32, i32) {
    %c0_i32 = arith.constant 0 : i32
    %c0_i32_0 = arith.constant 0 : i32
    %c0_i32_1 = arith.constant 0 : i32
    return %arg0, %c0_i32, %c0_i32_0 : i32, i32, i32
  }
  func.func @transform_1(%arg0: i32, %arg1: i32) -> (i32, i32, i32) {
    %c0_i32 = arith.constant 0 : i32
    %c0_i32_0 = arith.constant 0 : i32
    return %arg0, %c0_i32, %arg1 : i32, i32, i32
  }
  func.func @transform_2(%arg0: i32, %arg1: i32) -> (i32, i32) {
    %c0_i32 = arith.constant 0 : i32
    %c0_i32_0 = arith.constant 0 : i32
    %c0_i32_1 = arith.constant 0 : i32
    return %c0_i32, %c0_i32_0 : i32, i32
  }
  func.func @transform_3(%arg0: i32, %arg1: i32) -> (i32, i32) {
    %c0_i32 = arith.constant 0 : i32
    %c0_i32_0 = arith.constant 0 : i32
    %c0_i32_1 = arith.constant 0 : i32
    return %c0_i32, %c0_i32_0 : i32, i32
  }
  func.func @transform_4(%arg0: i32, %arg1: i32) -> i32 {
    %c0_i32 = arith.constant 0 : i32
    %c0_i32_0 = arith.constant 0 : i32
    return %c0_i32 : i32
  }
  func.func @transform_5(%arg0: i32, %arg1: i32) -> (i32, i32, i32) {
    %c0_i32 = arith.constant 0 : i32
    %c0_i32_0 = arith.constant 0 : i32
    return %arg0, %c0_i32, %arg1 : i32, i32, i32
  }
}

</mosaic_0001>

<bundles_post_ra>
// kernel: tpu_custom_call.1
= control target key start
LH: loop header
LB: loop body
LE: loop exit
PB: predicated region body
PF: predicated region fallthrough
CT: control target
= control target key end

     0   :  { %s1927_s0 = inlined_call_operand.vmem [shape: f32[2,16,256], index: 0, kind: input, shape index: {}]   ;;  %s1928_s1 = inlined_call_operand.hbm [shape: f32[2,16,256], index: 1, kind: input, shape index: {}]   ;;  %s1929_s2 = inlined_call_operand.vmem [shape: f32[33,16], index: 2, kind: input, shape index: {}]   ;;  %s1930_s3 = inlined_call_operand.vmem [shape: f32[33,1], index: 3, kind: input, shape index: {}]   ;;  %s1931_s4 = inlined_call_operand.<no memory space> [shape: f32[1], index: 4, kind: input, shape index: {}]   ;;  %s1932_s5 = inlined_call_operand.hbm [shape: f32[2,16,256], index: 5, kind: output, shape index: {}]  }
   0x1   :  { %10 = sst [smem:[#allocation5]] %s1931_s4 }
   0x2   :  { %11 = vsyncpa [#allocation7], 0 }
   0x3   :  { %13 = vsyncpa [#allocation7 + $0x1], 0 }
   0x4   :  { %14 = vsyncpa [#allocation8], 0 }
   0x5   :  { %16 = vsyncpa [#allocation8 + $0x1], 0  ;;  %s1536_s20 = smov 0   ;;  %s1538_s21 = smov 0  }
   0x6   :  { %s1540_s22 = smov 0   ;;  %s1542_s23 = smov 0  }
   0x7   :  { %s1544_s24 = smov 0   ;;  %s1546_s25 = smov 0  }
   0x8   :  { %s1548_s26 = smov 0   ;;  %s1550_s27 = smov 0  }
   0x9 LB: > { %1936 = sst [smem:[#allocation12_spill]] %s1462_s20  ;;  %s1134_s4 = sadd.s32 4294967295, %s1490_s27   ;;  %s1490_s27 = sphi %s1550_s27, %s22_s27   ;;  %s1486_s26 = sphi %s1548_s26, %s1953_s26   ;;  %s1482_s25 = sphi %s1546_s25, %s1952_s25   ;;  %s1478_s24 = sphi %s1544_s24, %s1951_s24   ;;  %s1474_s23 = sphi %s1542_s23, %s1950_s23   ;;  %s1470_s22 = sphi %s1540_s22, %s1949_s22   ;;  %s1466_s21 = sphi %s1538_s21, %s1948_s21   ;;  %s1462_s20 = sphi %s1536_s20, %s1947_s20  }
   0xa   : > { %s1135_s28 = sadd.s32 4294967294, %s1490_s27   ;;  %s31_s29 = sadd.s32 1, %s1482_s25 }
   0xb   : > { %s34_s30 = sadd.s32 1, %s1486_s26  ;;  %p32_p0 = scmp.ge.s32.totalorder %s31_s29, 2 }
   0xc   : > { %s69_s6 = sadd.s32 1, %s1470_s22  ;;  %p76_p1 = scmp.ne.s32.totalorder %s1470_s22, %s1466_s21 }
   0xd   : > { %p77_p2 = scmp.eq.s32.totalorder %s1490_s27, 0  ;;  %s1955_s29 = smov (%p32_p0, %s31_s29), 0 }
   0xe   : > { %1937 = sst [smem:[#allocation13_spill]] %s1955_s29  ;;  %s1957_s30 = smov (!%p32_p0, %s34_s30), %s1486_s26 }
   0xf   : > { %s65_s7 = ssub.s32 %s1482_s25, %s1955_s29  ;;  %p1589_p3 = por %p77_p2, %p76_p1 }
  0x10   : > { %p36_p4 = scmp.ge.s32.totalorder %s1957_s30, 2  ;;  %p82_p5 = scmp.ne.s32.totalorder %s1466_s21, %s1462_s20 }
  0x11   : > { %p83_p6 = scmp.eq.s32.totalorder %s1134_s4, 0  ;;  %p171_p7 = scmp.eq.s32.totalorder %s1134_s4, 3 }
  0x12   : > { %s1959_s30 = smov (%p36_p4, %s1957_s30), 0  ;;  %p177_p10 = scmp.eq.s32.totalorder %s1135_s28, 3 }
  0x13   : > { %1939 = sst [smem:[#allocation14_spill]] %s1959_s30  ;;  %p1597_p8 = por %p83_p6, %p82_p5 }
  0x14   : > { %p1601_p9 = por %p171_p7, %p76_p1  ;;  %s64_s11 = ssub.s32 %s1486_s26, %s1959_s30 }
  0x15   : > { %s66_s12 = sor.u32 %s65_s7, %s64_s11  ;;  %p1607_p12 = por %p177_p10, %p82_p5 }
  0x16   : > { %p67_p11 = scmp.eq.s32.totalorder %s66_s12, 0  ;;  %p1223_p13 = scmp.lt.s32.totalorder %s1490_s27, 4 }
  0x17   : > { %s214_s14 = sand.u32 1, %s1470_s22   ;;  %s1139_s17 = sshll.u32 %s1486_s26, 2 }
  0x18   : > { %s1614_s15 = scalar_select %p67_p11, %s1470_s22, %s69_s6  }
  0x19   : > { %s1138_s16 = sshll.u32 %s214_s14, 4  ;;  %s223_s18 = sadd.s32 %s1482_s25, %s1139_s17 }
  0x1a   : > { %s218_s19 = scalar_lea.vmem [#allocation6], %s1138_s16  ;;  %s1140_s29 = sshll.u32 %s223_s18, 7 }
  0x1b   : > { %s226_s4 = sshll.u32 %s218_s19, 4  ;;  %s225_s28 = scalar_lea.hbm %s1928_s1, %s1140_s29  ;;  %s227_s4 = int_to_ptr.vmem [resolvable:$true] %s226_s4 }
  0x1c   : > { %p1623_p0 = pnand %p1223_p13, %p1589_p3  ;;  %s215_s11 = scalar_lea.sflag [#allocation7], %s214_s14 }
  0x1d   : > { %s1379_s6 = scalar_lea.vmem %s227_s4, 256  ;;  %s1492_s12 = smov [#allocation6]  }
  0x1e   : > { %p1368_p1 = pneg %p1623_p0  ;;  %p1380_p2 = scmp.ne.s32.totalorder %s227_s4, %s1379_s6 }
  0x1f   : > { %s1384_s16 = sshll.u32 %s1492_s12, 4  ;;  %s1385_s16 = int_to_ptr.vmem [resolvable:$false] %s1384_s16 }
  0x20   : > { %p1382_p4 = pnand %p1380_p2, %p1368_p1  ;;  %s1386_s17 = scalar_lea.vmem %s1385_s16, 512 }
  0x21   : > { %p1387_p6 = scmp.lt.s32.totalorder %s227_s4, %s1385_s16  ;;  %p1388_p7 = scmp.lt.s32.totalorder %s1386_s17, %s1379_s6 }
  0x22   : > { %p1383_p5 = pneg %p1382_p4 }
  0x23   : > { %p1389_p10 = por %p1388_p7, %p1387_p6 }
  0x25   : > { %p1390_p11 = pnand %p1389_p10, %p1383_p5 }
  0x27   : > { %1393 = shalt.err (!%p1390_p11)
}
  0x28   : > { %s1493_s20 = smov 256   ;;  %s1494_s29 = smov 128  }
  0x29   : > { %s1495_s30 = smov 8   ;;  %p1141_p3 = scmp.ge.s32.totalorder %s1490_s27, 1 }
  0x2a   : > { %1218 = dma.hbm_to_vmem [thread:$0]  (!%p1623_p0), %s225_s28, 256, %s227_s4, %s215_s11, %s1493_s20, %s1494_s29, %s1495_s30  }
  0x2b   : > { %p234_p13 = scmp.lt.s32.totalorder %s1490_s27, 5 }
  0x2d   : > { %p235_p1 = pnand %p1141_p3, %p234_p13 }
  0x2e   : > { %s1634_s8 = sand.u32 (!%p235_p1), 1, %s1466_s21  }
  0x2f   : > { %238 = sbr.rel (%p235_p1) target bundleno = 1169 (0x491), region = 40  ;;  %s1142_s14 = sshll.u32 (!%p235_p1), %s1634_s8, 4 }
  0x30   : > { %s241_s18 = scalar_lea.sflag (!%p235_p1), [#allocation7], %s1634_s8  ;;  %s1638_s19 = scalar_lea.vmem (!%p235_p1), [#allocation6], %s1142_s14 }
  0x34   : > { %1453 = dma.done.wait (%p1597_p8), %s241_s18, 256  }
  0x35   : > { %1455 = vsyncadd (%p1597_p8), %s241_s18, 4294967040  ;;  %p276_p0 = scmp.lt.s32.totalorder %s1478_s24, 1  ;;  %s1649_s12 = scalar_lea.vmem [#allocation9], %s1142_s14 }
  0x36   : > { %p1146_p2 = scmp.ne.s32.totalorder %s1474_s23, 0 }
  0x37   : > { %s277_s4 = scalar_select %p276_p0, %s1478_s24, 1 }
  0x38   : > { %284 = sbr.rel (%p1146_p2) target bundleno = 450 (0x1c2), region = 48 }
  0x39   : > { %s1174_s28 = sshll.u32 %s277_s4, 5 }
  0x3a   : > { %s280_s6 = scalar_lea.vmem %s1927_s0, %s1174_s28 }
  0x3d   : > { %v288_v0 = vld [vmem:[%s280_s6 + $0x18] sm:$0xff]  ;;  %v287_v1 = vld [vmem:[%s280_s6 + $0x10] sm:$0xff]  ;;  %v286_v2 = vld [vmem:[%s280_s6 + $0x8] sm:$0xff]  ;;  %vm324_vm0 = vcmask 130048   ;;  %v1496_v6 = vmov 0.0   ;;  %v1497_v11 = vmov 0  }
  0x3e   : > { %368 = vmatprep.subr.mxu0 %v288_v0  ;;  %1175 = vmatprep.subr.mxu1 %v288_v0  ;;  %v285_v3 = vld [vmem:[%s280_s6] sm:$0xff]  ;;  %v292_v5 = vld [vmem:[%s1929_s2 + $0x18] sm:$0xff]  ;;  %v296_v8 = vld [vmem:[%s1930_s3 + $0x10] sm:$0xff]  ;;  %vm499_vm1 = vcmask 64512  }
  0x3f   : > { %369 = vmatpush1.msra.mxu0 %v287_v1  ;;  %1177 = vmatpush1.msra.mxu1 %v287_v1  ;;  %v289_v4 = vld [vmem:[%s1929_s2] sm:$0xff]  ;;  %v290_v9 = vld [vmem:[%s1929_s2 + $0x8] sm:$0xff]  ;;  %v297_v13 = vld [vmem:[%s1930_s3 + $0x18] sm:$0xff] }
  0x40   : > { %370 = vmatprep.subr.mxu0 %v286_v2  ;;  %1176 = vmatprep.subr.mxu1 %v286_v2  ;;  %v294_v7 = vld [vmem:[%s1930_s3] sm:$0xff]  ;;  %v295_v12 = vld [vmem:[%s1930_s3 + $0x8] sm:$0xff]  ;;  %v291_v14 = vld [vmem:[%s1929_s2 + $0x10] sm:$0xff] }
  0x41   : > { %371 = vmatpush1.msra.mxu0 %v285_v3  ;;  %1178 = vmatpush1.msra.mxu1 %v285_v3  ;;  %v293_v10 = vld [vmem:[%s1929_s2 + $0x20] sm:$0x1] }
  0x42   : > { %404 = vmatprep.mubr.f32.mxu0 %v1496_v6  ;;  %422 = vmatprep.mubr.f32.mxu1 %v1496_v6  ;;  %v298_v15 = vld [vmem:[%s1930_s3 + $0x20] sm:$0x1] }
  0x43   : > { %1147 = vmatmul.mubr.msk.f32.vlgmr.msra.gmra.mxu0 %vm324_vm0, %v289_v4  ;;  %1150 = vmatmul.mubr.msk.f32.vlgmr.msra.gmra.mxu1 %vm324_vm0, %v292_v5 }
  0x44   : > { %410 = vmatprep.mubr.f32.mxu0 %v1496_v6  ;;  %428 = vmatprep.mubr.f32.mxu1 %v1496_v6 }
  0x45   : > { %1298 = vset.pattern.permute.xlu0 %v1497_v11  ;;  %1299 = vset.pattern.permute.xlu1 %v1497_v11 }
  0x46   : > { %301 = vperm.xlu0 %1298, %v294_v7   ;;  %311 = vperm.xlu1 %1299, %v296_v8  }
  0x47   : > { %1148 = vmatmul.mubr.msk.f32.gmra.mxu0 %vm324_vm0, %v290_v9  ;;  %1151 = vmatmul.mubr.msk.f32.gmra.mxu1 %vm324_vm0, %v293_v10 }
  0x48   : > { %416 = vmatprep.mubr.f32.mxu0 %v1496_v6 }
  0x4a   : > { %306 = vperm.xlu0 %1298, %v295_v12   ;;  %316 = vperm.xlu1 %1299, %v297_v13  }
  0x4b   : > { %1149 = vmatmul.mubr.msk.f32.gmra.mxu0 %vm324_vm0, %v291_v14 }
  0x4e   : > { %321 = vperm.xlu0 %1298, %v298_v15  }
  0xc1   : > { %v302_v16 = vpop.permute.xlu0 %301  ;;  %v312_v17 = vpop.permute.xlu1 %311 }
  0xc5   : > { %v307_v18 = vpop.permute.xlu0 %306  ;;  %v317_v19 = vpop.permute.xlu1 %316 }
  0xc9   : > { %v322_v26 = vpop.permute.xlu0 %321 }
 0x103   : > { %v406_v20 = vpop.f32.mrf.mxu0  ;;  %v424_v21 = vpop.f32.mrf.mxu1 }
 0x104   : > { %v407_v22 = vadd.f32 %v406_v20, %v302_v16  ;;  %v425_v23 = vadd.f32 %v424_v21, %v317_v19 }
 0x105   : > { %v408_v24 = vpop.f32.mrf.mxu0  ;;  %v426_v25 = vpop.f32.mrf.mxu1 }
 0x106   : > { %v409_v27 = vadd.f32 %v408_v24, %v302_v16  ;;  %435 = vxpose.xlu1.b32.start.end [1/1] (short) %v407_v22, 128  ;;  %v427_v28 = vadd.f32 %v426_v25, %v317_v19  ;;  %536 = vst [vmem:[#allocation4 + $0x8] sm:$0xff] %v425_v23 }
 0x107   : > { %v412_v29 = vpop.f32.mrf.mxu0  ;;  %v430_v30 = vpop.f32.mrf.mxu1 }
 0x108   : > { %v413_v31 = vadd.f32 %v412_v29, %v307_v18  ;;  %v431_v32 = vadd.f32 %v430_v30, %v322_v26  ;;  %467 = vxpose.xlu0.b32.start.end [1/1] (short) %v409_v27, 128  ;;  %537 = vst [vmem:[#allocation4] sm:$0xff] %v427_v28 }
 0x109   : > { %v414_v33 = vpop.f32.mrf.mxu0  ;;  %v432_v34 = vpop.f32.mrf.mxu1 }
 0x10a   : > { %532 = vst [vmem:[#allocation3] sm:$0xff] %v413_v31  ;;  %538 = vst [vmem:[#allocation4 + $0x18] sm:$0x1] %v431_v32  ;;  %v415_v35 = vadd.f32 %v414_v33, %v307_v18  ;;  %v433_v36 = vadd.f32 %v432_v34, %v322_v26 }
 0x10b   : > { %v418_v37 = vpop.f32.mrf.mxu0 }
 0x10c   : > { %533 = vst [vmem:[#allocation3 + $0x8] sm:$0xff] %v415_v35  ;;  %539 = vst [vmem:[#allocation4 + $0x20] sm:$0x1] %v433_v36  ;;  %v419_v38 = vadd.f32 %v418_v37, %v312_v17 }
 0x10d   : > { %v420_v39 = vpop.f32.mrf.mxu0 }
 0x10e   : > { %534 = vst [vmem:[#allocation4 + $0x28] sm:$0xff] %v419_v38  ;;  %v421_v40 = vadd.f32 %v420_v39, %v312_v17 }
 0x110   : > { %535 = vst [vmem:[#allocation4 + $0x10] sm:$0xff] %v421_v40 }
 0x182   : > { %v451_v41 = vpop.trf.xlu1 }
 0x183   : > { %500 = vst.msk [vmem:[#allocation2] sm:$0xff] %vm499_vm1, %v451_v41 }
 0x184   : > { %v483_v42 = vpop.trf.xlu0 }
 0x185   : > { %516 = vst.msk [vmem:[#allocation2 + $0x80] sm:$0xff] %vm499_vm1, %v483_v42 }
 0x186   : > { %v452_v43 = vpop.trf.xlu1 }
 0x187   : > { %501 = vst.msk [vmem:[#allocation2 + $0x8] sm:$0xff] %vm499_vm1, %v452_v43 }
 0x188   : > { %v484_v44 = vpop.trf.xlu0 }
 0x189   : > { %517 = vst.msk [vmem:[#allocation2 + $0x88] sm:$0xff] %vm499_vm1, %v484_v44 }
 0x18a   : > { %v453_v45 = vpop.trf.xlu1 }
 0x18b   : > { %502 = vst.msk [vmem:[#allocation2 + $0x10] sm:$0xff] %vm499_vm1, %v453_v45 }
 0x18c   : > { %v485_v46 = vpop.trf.xlu0 }
 0x18d   : > { %518 = vst.msk [vmem:[#allocation2 + $0x90] sm:$0xff] %vm499_vm1, %v485_v46 }
 0x18e   : > { %v454_v47 = vpop.trf.xlu1 }
 0x18f   : > { %503 = vst.msk [vmem:[#allocation2 + $0x18] sm:$0xff] %vm499_vm1, %v454_v47 }
 0x190   : > { %v486_v48 = vpop.trf.xlu0 }
 0x191   : > { %519 = vst.msk [vmem:[#allocation2 + $0x98] sm:$0xff] %vm499_vm1, %v486_v48 }
 0x192   : > { %v455_v49 = vpop.trf.xlu1 }
 0x193   : > { %504 = vst.msk [vmem:[#allocation2 + $0x20] sm:$0xff] %vm499_vm1, %v455_v49 }
 0x194   : > { %v487_v50 = vpop.trf.xlu0 }
 0x195   : > { %520 = vst.msk [vmem:[#allocation2 + $0xa0] sm:$0xff] %vm499_vm1, %v487_v50 }
 0x196   : > { %v456_v51 = vpop.trf.xlu1 }
 0x197   : > { %505 = vst.msk [vmem:[#allocation2 + $0x28] sm:$0xff] %vm499_vm1, %v456_v51 }
 0x198   : > { %v488_v52 = vpop.trf.xlu0 }
 0x199   : > { %521 = vst.msk [vmem:[#allocation2 + $0xa8] sm:$0xff] %vm499_vm1, %v488_v52 }
 0x19a   : > { %v457_v53 = vpop.trf.xlu1 }
 0x19b   : > { %506 = vst.msk [vmem:[#allocation2 + $0x30] sm:$0xff] %vm499_vm1, %v457_v53 }
 0x19c   : > { %v489_v54 = vpop.trf.xlu0 }
 0x19d   : > { %522 = vst.msk [vmem:[#allocation2 + $0xb0] sm:$0xff] %vm499_vm1, %v489_v54 }
 0x19e   : > { %v458_v55 = vpop.trf.xlu1 }
 0x19f   : > { %507 = vst.msk [vmem:[#allocation2 + $0x38] sm:$0xff] %vm499_vm1, %v458_v55 }
 0x1a0   : > { %v490_v56 = vpop.trf.xlu0 }
 0x1a1   : > { %523 = vst.msk [vmem:[#allocation2 + $0xb8] sm:$0xff] %vm499_vm1, %v490_v56 }
 0x1a2   : > { %v459_v57 = vpop.trf.xlu1 }
 0x1a3   : > { %508 = vst.msk [vmem:[#allocation2 + $0x40] sm:$0xff] %vm499_vm1, %v459_v57 }
 0x1a4   : > { %v491_v58 = vpop.trf.xlu0 }
 0x1a5   : > { %524 = vst.msk [vmem:[#allocation2 + $0xc0] sm:$0xff] %vm499_vm1, %v491_v58 }
 0x1a6   : > { %v460_v59 = vpop.trf.xlu1 }
 0x1a7   : > { %509 = vst.msk [vmem:[#allocation2 + $0x48] sm:$0xff] %vm499_vm1, %v460_v59 }
 0x1a8   : > { %v492_v60 = vpop.trf.xlu0 }
 0x1a9   : > { %525 = vst.msk [vmem:[#allocation2 + $0xc8] sm:$0xff] %vm499_vm1, %v492_v60 }
 0x1aa   : > { %v461_v61 = vpop.trf.xlu1 }
 0x1ab   : > { %510 = vst.msk [vmem:[#allocation2 + $0x50] sm:$0xff] %vm499_vm1, %v461_v61 }
 0x1ac   : > { %v493_v62 = vpop.trf.xlu0 }
 0x1ad   : > { %526 = vst.msk [vmem:[#allocation2 + $0xd0] sm:$0xff] %vm499_vm1, %v493_v62 }
 0x1ae   : > { %v462_v63 = vpop.trf.xlu1 }
 0x1af   : > { %511 = vst.msk [vmem:[#allocation2 + $0x58] sm:$0xff] %vm499_vm1, %v462_v63 }
 0x1b0   : > { %v494_v0 = vpop.trf.xlu0 }
 0x1b1   : > { %527 = vst.msk [vmem:[#allocation2 + $0xd8] sm:$0xff] %vm499_vm1, %v494_v0 }
 0x1b2   : > { %v463_v1 = vpop.trf.xlu1 }
 0x1b3   : > { %512 = vst.msk [vmem:[#allocation2 + $0x60] sm:$0xff] %vm499_vm1, %v463_v1 }
 0x1b4   : > { %v495_v2 = vpop.trf.xlu0 }
 0x1b5   : > { %528 = vst.msk [vmem:[#allocation2 + $0xe0] sm:$0xff] %vm499_vm1, %v495_v2 }
 0x1b6   : > { %v464_v3 = vpop.trf.xlu1 }
 0x1b7   : > { %513 = vst.msk [vmem:[#allocation2 + $0x68] sm:$0xff] %vm499_vm1, %v464_v3 }
 0x1b8   : > { %v496_v4 = vpop.trf.xlu0 }
 0x1b9   : > { %529 = vst.msk [vmem:[#allocation2 + $0xe8] sm:$0xff] %vm499_vm1, %v496_v4 }
 0x1ba   : > { %v465_v5 = vpop.trf.xlu1 }
 0x1bb   : > { %514 = vst.msk [vmem:[#allocation2 + $0x70] sm:$0xff] %vm499_vm1, %v465_v5 }
 0x1bc   : > { %v497_v6 = vpop.trf.xlu0 }
 0x1bd   : > { %530 = vst.msk [vmem:[#allocation2 + $0xf0] sm:$0xff] %vm499_vm1, %v497_v6 }
 0x1be   : > { %v466_v7 = vpop.trf.xlu1 }
 0x1bf   : > { %515 = vst.msk [vmem:[#allocation2 + $0x78] sm:$0xff] %vm499_vm1, %v466_v7 }
 0x1c0   : > { %v498_v8 = vpop.trf.xlu0 }
 0x1c1   : > { %531 = vst.msk [vmem:[#allocation2 + $0xf8] sm:$0xff] %vm499_vm1, %v498_v8 }
 0x1c2 PF: > { %v559_v9 = vld [vmem:[#allocation3 + $0x8] sm:$0xff]  ;;  %v558_v10 = vld [vmem:[#allocation3] sm:$0xff]  ;;  %s1152_s18 = sshll.u32 %s1474_s23, 7  ;;  %vm560_vm2 = vcmask 64512   ;;  %v1498_v11 = vmov 0.0   ;;  %s1007_s28 = sld [smem:[#allocation5]] }
 0x1c3   : > { %639 = vmatprep.subr.mxu0 %v559_v9  ;;  %673 = vmatprep.mubr.f32.mxu0 %v1498_v11  ;;  %s1720_s4 = scalar_lea.vmem [#allocation2], %s1152_s18  ;;  %s1170_s7 = sshll.u32 %s1478_s24, 2 }
 0x1c4   : > { %640 = vmatpush1.msra.mxu0 %v558_v10  ;;  %s1029_s11 = sadd.s32 %s1474_s23, %s1170_s7  ;;  %s1032_s9 = sshll.u32 %s1649_s12, 4  ;;  %s1872_s9 = int_to_ptr.vmem [resolvable:$true] %s1032_s9 }
 0x1c5   : > { %s1171_s6 = sshll.u32 %s1029_s11, 7  ;;  %s1018_s23 = scalar_lea.sflag [#allocation8], %s1634_s8 }
 0x1c6   : > { %s1870_s24 = scalar_lea.hbm %s1932_s5, %s1171_s6  ;;  %s1394_s20 = scalar_lea.vmem %s1872_s9, 256 }
 0x1c7   : > { %p1395_p8 = scmp.ne.s32.totalorder %s1872_s9, %s1394_s20 }
 0x1c8   : > { %v542_v12 = vld [vmem:[%s1720_s4] sm:$0xff]  ;;  %v543_v13 = vld [vmem:[%s1720_s4 + $0x8] sm:$0xff]  ;;  %v544_v14 = vld [vmem:[%s1720_s4 + $0x10] sm:$0xff] }
 0x1c9   : > { %1153 = vmatmul.mubr.msk.f32.vlgmr.msra.gmra.mxu0 %vm560_vm2, %v542_v12  ;;  %v545_v15 = vld [vmem:[%s1720_s4 + $0x18] sm:$0xff]  ;;  %v546_v16 = vld [vmem:[%s1720_s4 + $0x20] sm:$0xff]  ;;  %v547_v17 = vld [vmem:[%s1720_s4 + $0x28] sm:$0xff]  ;;  %p1396_p4 = pnand %p1395_p8, %p1601_p9 }
 0x1ca   : > { %679 = vmatprep.mubr.f32.mxu0 %v1498_v11  ;;  %v548_v18 = vld [vmem:[%s1720_s4 + $0x30] sm:$0xff]  ;;  %v549_v19 = vld [vmem:[%s1720_s4 + $0x38] sm:$0xff]  ;;  %v550_v20 = vld [vmem:[%s1720_s4 + $0x40] sm:$0xff] }
 0x1cb   : > { %v551_v21 = vld [vmem:[%s1720_s4 + $0x48] sm:$0xff]  ;;  %v552_v22 = vld [vmem:[%s1720_s4 + $0x50] sm:$0xff]  ;;  %v553_v23 = vld [vmem:[%s1720_s4 + $0x58] sm:$0xff]  ;;  %p1397_p5 = pneg %p1396_p4 }
 0x1cc   : > { %v554_v24 = vld [vmem:[%s1720_s4 + $0x60] sm:$0xff]  ;;  %v555_v25 = vld [vmem:[%s1720_s4 + $0x68] sm:$0xff]  ;;  %v556_v26 = vld [vmem:[%s1720_s4 + $0x70] sm:$0xff] }
 0x1cd   : > { %1154 = vmatmul.mubr.msk.f32.gmra.mxu0 %vm560_vm2, %v543_v13  ;;  %v557_v27 = vld [vmem:[%s1720_s4 + $0x78] sm:$0xff]  ;;  %v917_v12 = vld [vmem:[#allocation4] sm:$0xff]  ;;  %v915_v13 = vld [vmem:[#allocation4 + $0x10] sm:$0xff] }
 0x1ce   : > { %685 = vmatprep.mubr.f32.mxu0 %v1498_v11  ;;  %989 = vmatprep.mubr.f32.mxu1 %v917_v12 }
 0x1d1   : > { %1155 = vmatmul.mubr.msk.f32.gmra.mxu0 %vm560_vm2, %v544_v14 }
 0x1d2   : > { %691 = vmatprep.mubr.f32.mxu0 %v1498_v11 }
 0x1d5   : > { %1156 = vmatmul.mubr.msk.f32.gmra.mxu0 %vm560_vm2, %v545_v15 }
 0x1d6   : > { %697 = vmatprep.mubr.f32.mxu0 %v1498_v11 }
 0x1d9   : > { %1157 = vmatmul.mubr.msk.f32.gmra.mxu0 %vm560_vm2, %v546_v16 }
 0x1da   : > { %703 = vmatprep.mubr.f32.mxu0 %v1498_v11 }
 0x1dd   : > { %1158 = vmatmul.mubr.msk.f32.gmra.mxu0 %vm560_vm2, %v547_v17 }
 0x1de   : > { %709 = vmatprep.mubr.f32.mxu0 %v1498_v11 }
 0x1e1   : > { %1159 = vmatmul.mubr.msk.f32.gmra.mxu0 %vm560_vm2, %v548_v18 }
 0x1e2   : > { %715 = vmatprep.mubr.f32.mxu0 %v1498_v11 }
 0x1e5   : > { %1160 = vmatmul.mubr.msk.f32.gmra.mxu0 %vm560_vm2, %v549_v19 }
 0x1e6   : > { %721 = vmatprep.mubr.f32.mxu0 %v1498_v11 }
 0x1e9   : > { %1161 = vmatmul.mubr.msk.f32.gmra.mxu0 %vm560_vm2, %v550_v20 }
 0x1ea   : > { %727 = vmatprep.mubr.f32.mxu0 %v1498_v11 }
 0x1ed   : > { %1162 = vmatmul.mubr.msk.f32.gmra.mxu0 %vm560_vm2, %v551_v21 }
 0x1ee   : > { %733 = vmatprep.mubr.f32.mxu0 %v1498_v11 }
 0x1f1   : > { %1163 = vmatmul.mubr.msk.f32.gmra.mxu0 %vm560_vm2, %v552_v22 }
 0x1f2   : > { %739 = vmatprep.mubr.f32.mxu0 %v1498_v11 }
 0x1f5   : > { %1164 = vmatmul.mubr.msk.f32.gmra.mxu0 %vm560_vm2, %v553_v23 }
 0x1f6   : > { %745 = vmatprep.mubr.f32.mxu0 %v1498_v11 }
 0x1f9   : > { %1165 = vmatmul.mubr.msk.f32.gmra.mxu0 %vm560_vm2, %v554_v24 }
 0x1fa   : > { %751 = vmatprep.mubr.f32.mxu0 %v1498_v11 }
 0x1fd   : > { %1166 = vmatmul.mubr.msk.f32.gmra.mxu0 %vm560_vm2, %v555_v25 }
 0x1fe   : > { %757 = vmatprep.mubr.f32.mxu0 %v1498_v11 }
 0x201   : > { %1167 = vmatmul.mubr.msk.f32.gmra.mxu0 %vm560_vm2, %v556_v26 }
 0x202   : > { %763 = vmatprep.mubr.f32.mxu0 %v1498_v11 }
 0x205   : > { %1168 = vmatmul.mubr.msk.f32.gmra.mxu0 %vm560_vm2, %v557_v27 }
 0x206   : > { %984 = vmatprep.mubr.f32.mxu0 %v915_v13 }
 0x289   : > { %v1754_v28 = vpop.f32.mrf.mxu0 }
 0x28b   : > { %v1756_v29 = vpop.f32.mrf.mxu0 }
 0x28c   : > { %v770_v8 = vmax.f32 %v1754_v28, %v1756_v29 }
 0x28d   : > { %v1758_v30 = vpop.f32.mrf.mxu0 }
 0x28f   : > { %v1760_v31 = vpop.f32.mrf.mxu0 }
 0x290   : > { %v773_v11 = vmax.f32 %v1758_v30, %v1760_v31 }
 0x291   : > { %v1762_v32 = vpop.f32.mrf.mxu0 }
 0x293   : > { %v1764_v33 = vpop.f32.mrf.mxu0 }
 0x294   : > { %v776_v6 = vmax.f32 %v1762_v32, %v1764_v33 }
 0x295   : > { %v1766_v34 = vpop.f32.mrf.mxu0 }
 0x297   : > { %v1768_v35 = vpop.f32.mrf.mxu0 }
 0x298   : > { %v779_v10 = vmax.f32 %v1766_v34, %v1768_v35 }
 0x299   : > { %v1770_v36 = vpop.f32.mrf.mxu0 }
 0x29b   : > { %v1772_v37 = vpop.f32.mrf.mxu0 }
 0x29c   : > { %v782_v4 = vmax.f32 %v1770_v36, %v1772_v37 }
 0x29d   : > { %v1774_v38 = vpop.f32.mrf.mxu0 }
 0x29f   : > { %v1776_v39 = vpop.f32.mrf.mxu0 }
 0x2a0   : > { %v785_v9 = vmax.f32 %v1774_v38, %v1776_v39 }
 0x2a1   : > { %v1778_v40 = vpop.f32.mrf.mxu0 }
 0x2a3   : > { %v1780_v41 = vpop.f32.mrf.mxu0 }
 0x2a4   : > { %v788_v2 = vmax.f32 %v1778_v40, %v1780_v41 }
 0x2a5   : > { %v1782_v42 = vpop.f32.mrf.mxu0 }
 0x2a7   : > { %v1784_v43 = vpop.f32.mrf.mxu0 }
 0x2a8   : > { %v791_v7 = vmax.f32 %v1782_v42, %v1784_v43 }
 0x2a9   : > { %v1786_v44 = vpop.f32.mrf.mxu0 }
 0x2ab   : > { %v1788_v45 = vpop.f32.mrf.mxu0 }
 0x2ac   : > { %v794_v0 = vmax.f32 %v1786_v44, %v1788_v45 }
 0x2ad   : > { %v1790_v46 = vpop.f32.mrf.mxu0 }
 0x2af   : > { %v1792_v47 = vpop.f32.mrf.mxu0 }
 0x2b0   : > { %v797_v5 = vmax.f32 %v1790_v46, %v1792_v47 }
 0x2b1   : > { %v1794_v48 = vpop.f32.mrf.mxu0 }
 0x2b3   : > { %v1796_v49 = vpop.f32.mrf.mxu0 }
 0x2b4   : > { %v800_v62 = vmax.f32 %v1794_v48, %v1796_v49 }
 0x2b5   : > { %v1798_v50 = vpop.f32.mrf.mxu0 }
 0x2b7   : > { %v1800_v51 = vpop.f32.mrf.mxu0 }
 0x2b8   : > { %v803_v3 = vmax.f32 %v1798_v50, %v1800_v51 }
 0x2b9   : > { %v1802_v52 = vpop.f32.mrf.mxu0 }
 0x2bb   : > { %v1804_v53 = vpop.f32.mrf.mxu0 }
 0x2bc   : > { %v806_v59 = vmax.f32 %v1802_v52, %v1804_v53 }
 0x2bd   : > { %v1806_v54 = vpop.f32.mrf.mxu0 }
 0x2bf   : > { %v755_v55 = vpop.f32.mrf.mxu0 }
 0x2c0   : > { %v809_v56 = vmax.f32 %v1806_v54, %v755_v55 }
 0x2c1   : > { %v759_v57 = vpop.f32.mrf.mxu0 }
 0x2c2   : > { %810 = vmax.xlane.f32.xlu1 %v809_v56 }
 0x2c3   : > { %v761_v58 = vpop.f32.mrf.mxu0 }
 0x2c4   : > { %v812_v1 = vmax.f32 %v759_v57, %v761_v58 }
 0x2c5   : > { %v765_v60 = vpop.f32.mrf.mxu0 }
 0x2c6   : > { %807 = vmax.xlane.f32.xlu1 %v806_v59 }
 0x2c7   : > { %v767_v61 = vpop.f32.mrf.mxu0 }
 0x2c8   : > { %v815_v63 = vmax.f32 %v765_v60, %v767_v61 }
 0x2ca   : > { %801 = vmax.xlane.f32.xlu1 %v800_v62  ;;  %816 = vmax.xlane.f32.xlu0 %v815_v63 }
 0x2ce   : > { %795 = vmax.xlane.f32.xlu1 %v794_v0  ;;  %813 = vmax.xlane.f32.xlu0 %v812_v1 }
 0x2d2   : > { %789 = vmax.xlane.f32.xlu1 %v788_v2  ;;  %804 = vmax.xlane.f32.xlu0 %v803_v3 }
 0x2d6   : > { %783 = vmax.xlane.f32.xlu1 %v782_v4  ;;  %798 = vmax.xlane.f32.xlu0 %v797_v5 }
 0x2da   : > { %777 = vmax.xlane.f32.xlu1 %v776_v6  ;;  %792 = vmax.xlane.f32.xlu0 %v791_v7 }
 0x2de   : > { %771 = vmax.xlane.f32.xlu1 %v770_v8  ;;  %786 = vmax.xlane.f32.xlu0 %v785_v9 }
 0x2e2   : > { %780 = vmax.xlane.f32.xlu0 %v779_v10 }
 0x2e6   : > { %774 = vmax.xlane.f32.xlu0 %v773_v11 }
 0x34b   : > { %v811_v15 = vpop.xlane.xlu1 %810 }
 0x34c   : > { %v845_v22 = vsub.f32 %v755_v55, %v811_v15  ;;  %v844_v27 = vsub.f32 %v1806_v54, %v811_v15 }
 0x34e   : > { %v904_v56 = vmul.f32 1.442695, %v845_v22 }
 0x34f   : > { %v808_v24 = vpop.xlane.xlu1 %807 }
 0x350   : > { %v843_v59 = vsub.f32 %v1804_v53, %v808_v24 }
 0x353   : > { %v817_v14 = vpop.xlane.xlu0 %816 }
 0x354   : > { %v848_v16 = vsub.f32 %v765_v60, %v817_v14  ;;  %v849_v17 = vsub.f32 %v767_v61, %v817_v14  ;;  %v902_v60 = vmul.f32 1.442695, %v844_v27  ;;  %v842_v61 = vsub.f32 %v1802_v52, %v808_v24 }
 0x356   : > { %v910_v18 = vmul.f32 1.442695, %v848_v16  ;;  %v912_v19 = vmul.f32 1.442695, %v849_v17  ;;  %v898_v63 = vmul.f32 1.442695, %v842_v61 }
 0x357   : > { %v814_v20 = vpop.xlane.xlu0 %813 }
 0x358   : > { %v846_v21 = vsub.f32 %v759_v57, %v814_v20  ;;  %v847_v23 = vsub.f32 %v761_v58, %v814_v20  ;;  %1300 = vpow2.f32 %v910_v18  ;;  %v900_v57 = vmul.f32 1.442695, %v843_v59  ;;  %v802_v58 = vpop.xlane.xlu1 %801 }
 0x359   : > { %1302 = vpow2.f32 %v912_v19  ;;  %v839_v54 = vsub.f32 %v1796_v49, %v802_v58  ;;  %v838_v4 = vsub.f32 %v1794_v48, %v802_v58 }
 0x35a   : > { %v906_v25 = vmul.f32 1.442695, %v846_v21  ;;  %v908_v26 = vmul.f32 1.442695, %v847_v23 }
 0x35b   : > { %v805_v62 = vpop.xlane.xlu0 %804  ;;  %v892_v5 = vmul.f32 1.442695, %v839_v54  ;;  %v890_v49 = vmul.f32 1.442695, %v838_v4 }
 0x35c   : > { %1304 = vpow2.f32 %v906_v25  ;;  %v841_v55 = vsub.f32 %v1800_v51, %v805_v62  ;;  %v840_v0 = vsub.f32 %v1798_v50, %v805_v62  ;;  %v796_v6 = vpop.xlane.xlu1 %795 }
 0x35d   : > { %1306 = vpow2.f32 %v908_v26  ;;  %v835_v9 = vsub.f32 %v1788_v45, %v796_v6 }
 0x35e   : > { %1308 = vpow2.f32 %v904_v56  ;;  %v896_v1 = vmul.f32 1.442695, %v841_v55  ;;  %v894_v52 = vmul.f32 1.442695, %v840_v0 }
 0x35f   : > { %1310 = vpow2.f32 %v902_v60  ;;  %v799_v53 = vpop.xlane.xlu0 %798  ;;  %v884_v14 = vmul.f32 1.442695, %v835_v9 }
 0x360   : > { %1312 = vpow2.f32 %v900_v57  ;;  %v837_v51 = vsub.f32 %v1792_v47, %v799_v53  ;;  %v836_v8 = vsub.f32 %v1790_v46, %v799_v53  ;;  %v834_v47 = vsub.f32 %v1786_v44, %v796_v6  ;;  %v790_v45 = vpop.xlane.xlu1 %789 }
 0x361   : > { %1314 = vpow2.f32 %v898_v63  ;;  %v831_v44 = vsub.f32 %v1780_v41, %v790_v45 }
 0x362   : > { %1316 = vpow2.f32 %v896_v1  ;;  %v888_v48 = vmul.f32 1.442695, %v837_v51  ;;  %v886_v12 = vmul.f32 1.442695, %v836_v8  ;;  %v882_v16 = vmul.f32 1.442695, %v834_v47 }
 0x363   : > { %1318 = vpow2.f32 %v894_v52  ;;  %v793_v11 = vpop.xlane.xlu0 %792  ;;  %v876_v24 = vmul.f32 1.442695, %v831_v44 }
 0x364   : > { %1320 = vpow2.f32 %v892_v5  ;;  %v833_v46 = vsub.f32 %v1784_v43, %v793_v11  ;;  %v832_v17 = vsub.f32 %v1782_v42, %v793_v11  ;;  %v830_v43 = vsub.f32 %v1778_v40, %v790_v45  ;;  %v784_v26 = vpop.xlane.xlu1 %783  ;;  %v916_v45 = vld [vmem:[#allocation4 + $0x8] sm:$0xff] }
 0x365   : > { %v1301_v2 = vpop.eup %1300  ;;  %1322 = vpow2.f32 %v890_v49  ;;  %v827_v40 = vsub.f32 %v1772_v37, %v784_v26 }
 0x366   : > { %v1303_v3 = vpop.eup %1302  ;;  %1324 = vpow2.f32 %v888_v48  ;;  %v880_v19 = vmul.f32 1.442695, %v833_v46  ;;  %v878_v22 = vmul.f32 1.442695, %v832_v17  ;;  %v874_v41 = vmul.f32 1.442695, %v830_v43 }
 0x367   : > { %920 = vmatprep.subr.mxu0 %v1303_v3  ;;  %1179 = vmatprep.subr.mxu1 %v1303_v3  ;;  %1326 = vpow2.f32 %v886_v12  ;;  %v787_v21 = vpop.xlane.xlu0 %786  ;;  %v868_v55 = vmul.f32 1.442695, %v827_v40  ;;  %v919_v17 = vld [vmem:[#allocation4 + $0x20] sm:$0x1] }
 0x368   : > { %921 = vmatpush1.xpose.msra.mxu0 %v1301_v2  ;;  %1195 = vmatpush1.xpose.msra.mxu1 %v1301_v2  ;;  %1328 = vpow2.f32 %v884_v14  ;;  %v829_v42 = vsub.f32 %v1776_v39, %v787_v21  ;;  %v828_v27 = vsub.f32 %v1774_v38, %v787_v21  ;;  %v826_v39 = vsub.f32 %v1770_v36, %v784_v26  ;;  %v778_v63 = vpop.xlane.xlu1 %777  ;;  %v1011_v40 = vld [vmem:[%s1638_s19] sm:$0xff] }
 0x369   : > { %v1305_v50 = vpop.eup %1304  ;;  %1330 = vpow2.f32 %v882_v16  ;;  %v823_v36 = vsub.f32 %v1764_v33, %v778_v63  ;;  %v914_v16 = vld [vmem:[#allocation4 + $0x28] sm:$0xff] }
 0x36a   : > { %v1307_v7 = vpop.eup %1306  ;;  %1332 = vpow2.f32 %v880_v19  ;;  %v872_v59 = vmul.f32 1.442695, %v829_v42  ;;  %v870_v61 = vmul.f32 1.442695, %v828_v27  ;;  %v866_v37 = vmul.f32 1.442695, %v826_v39 }
 0x36b   : > { %922 = vmatprep.subr.mxu0 %v1307_v7  ;;  %1180 = vmatprep.subr.mxu1 %v1307_v7  ;;  %v1309_v10 = vpop.eup %1308  ;;  %1334 = vpow2.f32 %v878_v22  ;;  %v781_v60 = vpop.xlane.xlu0 %780  ;;  %v860_v52 = vmul.f32 1.442695, %v823_v36 }
 0x36c   : > { %923 = vmatpush1.xpose.msra.mxu0 %v1305_v50  ;;  %1196 = vmatpush1.xpose.msra.mxu1 %v1305_v50  ;;  %v1311_v13 = vpop.eup %1310  ;;  %1336 = vpow2.f32 %v876_v24  ;;  %v825_v38 = vsub.f32 %v1768_v35, %v781_v60  ;;  %v824_v0 = vsub.f32 %v1766_v34, %v781_v60  ;;  %v822_v35 = vsub.f32 %v1762_v32, %v778_v63  ;;  %v772_v51 = vpop.xlane.xlu1 %771 }
 0x36d   : > { %924 = vmatprep.subr.mxu0 %v1309_v10  ;;  %1181 = vmatprep.subr.mxu1 %v1309_v10  ;;  %v1313_v15 = vpop.eup %1312  ;;  %1338 = vpow2.f32 %v874_v41  ;;  %v819_v32 = vsub.f32 %v1756_v29, %v772_v51  ;;  %v1008_v41 = vstv %s1007_s28 }
 0x36e   : > { %v1315_v18 = vpop.eup %1314  ;;  %1340 = vpow2.f32 %v872_v59  ;;  %v864_v1 = vmul.f32 1.442695, %v825_v38  ;;  %v862_v3 = vmul.f32 1.442695, %v824_v0  ;;  %v858_v33 = vmul.f32 1.442695, %v822_v35 }
 0x36f   : > { %v1317_v20 = vpop.eup %1316  ;;  %1342 = vpow2.f32 %v870_v61  ;;  %v775_v2 = vpop.xlane.xlu0 %774  ;;  %v852_v48 = vmul.f32 1.442695, %v819_v32  ;;  %v1012_v59 = vld [vmem:[%s1638_s19 + $0x8] sm:$0xff]  ;;  %s1499_s19 = smov [#allocation9]  }
 0x370   : > { %925 = vmatpush1.xpose.msra.mxu0 %v1311_v13  ;;  %1197 = vmatpush1.xpose.msra.mxu1 %v1311_v13  ;;  %v1319_v23 = vpop.eup %1318  ;;  %1344 = vpow2.f32 %v868_v55  ;;  %v821_v34 = vsub.f32 %v1760_v31, %v775_v2  ;;  %v820_v6 = vsub.f32 %v1758_v30, %v775_v2  ;;  %v818_v31 = vsub.f32 %v1754_v28, %v772_v51  ;;  %s1398_s29 = sshll.u32 %s1499_s19, 4  ;;  %s1399_s29 = int_to_ptr.vmem [resolvable:$false] %s1398_s29 }
 0x371   : > { %926 = vmatprep.subr.mxu0 %v1313_v15  ;;  %1182 = vmatprep.subr.mxu1 %v1313_v15  ;;  %v1321_v25 = vpop.eup %1320  ;;  %1346 = vpow2.f32 %v866_v37  ;;  %s1400_s30 = scalar_lea.vmem %s1399_s29, 512  ;;  %p1401_p6 = scmp.lt.s32.totalorder %s1872_s9, %s1399_s29 }
 0x372   : > { %v1323_v56 = vpop.eup %1322  ;;  %1348 = vpow2.f32 %v864_v1  ;;  %v856_v7 = vmul.f32 1.442695, %v821_v34  ;;  %v854_v8 = vmul.f32 1.442695, %v820_v6  ;;  %v850_v30 = vmul.f32 1.442695, %v818_v31  ;;  %p1402_p7 = scmp.lt.s32.totalorder %s1400_s30, %s1394_s20 }
 0x373   : > { %v1325_v62 = vpop.eup %1324  ;;  %1350 = vpow2.f32 %v862_v3 }
 0x374   : > { %927 = vmatpush1.xpose.msra.mxu0 %v1315_v18  ;;  %1198 = vmatpush1.xpose.msra.mxu1 %v1315_v18  ;;  %v1327_v57 = vpop.eup %1326  ;;  %1352 = vpow2.f32 %v860_v52  ;;  %v918_v18 = vld [vmem:[#allocation4 + $0x18] sm:$0x1]  ;;  %p1403_p10 = por %p1402_p7, %p1401_p6 }
 0x375   : > { %928 = vmatprep.subr.mxu0 %v1317_v20  ;;  %1183 = vmatprep.subr.mxu1 %v1317_v20  ;;  %v1329_v58 = vpop.eup %1328  ;;  %1354 = vpow2.f32 %v858_v33 }
 0x376   : > { %v1331_v54 = vpop.eup %1330  ;;  %1356 = vpow2.f32 %v856_v7  ;;  %p1404_p11 = pnand %p1403_p10, %p1397_p5 }
 0x377   : > { %v1333_v53 = vpop.eup %1332  ;;  %1358 = vpow2.f32 %v854_v8 }
 0x378   : > { %929 = vmatpush1.xpose.msra.mxu0 %v1319_v23  ;;  %1199 = vmatpush1.xpose.msra.mxu1 %v1319_v23  ;;  %v1335_v4 = vpop.eup %1334  ;;  %1360 = vpow2.f32 %v852_v48  ;;  %v1001_v23 = vlaneseq }
 0x379   : > { %930 = vmatprep.subr.mxu0 %v1321_v25  ;;  %1184 = vmatprep.subr.mxu1 %v1321_v25  ;;  %v1337_v5 = vpop.eup %1336  ;;  %1362 = vpow2.f32 %v850_v30 }
 0x37a   : > { %v1339_v50 = vpop.eup %1338  ;;  %v1002_v24 = vshrl.u32 %v1001_v23, 7 }
 0x37b   : > { %v1341_v49 = vpop.eup %1340 }
 0x37c   : > { %931 = vmatpush1.xpose.msra.mxu0 %v1323_v56  ;;  %1200 = vmatpush1.xpose.msra.mxu1 %v1323_v56  ;;  %v1343_v9 = vpop.eup %1342  ;;  %v1003_v42 = vsub.s32 0, %v1002_v24 }
 0x37d   : > { %932 = vmatprep.subr.mxu0 %v1325_v62  ;;  %1185 = vmatprep.subr.mxu1 %v1325_v62  ;;  %v1345_v10 = vpop.eup %1344 }
 0x37e   : > { %v1347_v29 = vpop.eup %1346 }
 0x37f   : > { %v1349_v11 = vpop.eup %1348 }
 0x380   : > { %933 = vmatpush1.xpose.msra.mxu0 %v1327_v57  ;;  %1201 = vmatpush1.xpose.msra.mxu1 %v1327_v57  ;;  %v1351_v28 = vpop.eup %1350 }
 0x381   : > { %934 = vmatprep.subr.mxu0 %v1329_v58  ;;  %1186 = vmatprep.subr.mxu1 %v1329_v58  ;;  %v1353_v47 = vpop.eup %1352 }
 0x382   : > { %v1355_v12 = vpop.eup %1354 }
 0x383   : > { %v1357_v13 = vpop.eup %1356 }
 0x384   : > { %935 = vmatpush1.xpose.msra.mxu0 %v1331_v54  ;;  %1202 = vmatpush1.xpose.msra.mxu1 %v1331_v54  ;;  %v1359_v14 = vpop.eup %1358 }
 0x385   : > { %936 = vmatprep.subr.mxu0 %v1333_v53  ;;  %1187 = vmatprep.subr.mxu1 %v1333_v53  ;;  %v1361_v46 = vpop.eup %1360 }
 0x386   : > { %v1363_v15 = vpop.eup %1362 }
 0x388   : > { %937 = vmatpush1.xpose.msra.mxu0 %v1335_v4  ;;  %1203 = vmatpush1.xpose.msra.mxu1 %v1335_v4 }
 0x389   : > { %938 = vmatprep.subr.mxu0 %v1337_v5  ;;  %1188 = vmatprep.subr.mxu1 %v1337_v5 }
 0x38c   : > { %939 = vmatpush1.xpose.msra.mxu0 %v1339_v50  ;;  %1204 = vmatpush1.xpose.msra.mxu1 %v1339_v50 }
 0x38d   : > { %940 = vmatprep.subr.mxu0 %v1341_v49  ;;  %1189 = vmatprep.subr.mxu1 %v1341_v49 }
 0x390   : > { %941 = vmatpush1.xpose.msra.mxu0 %v1343_v9  ;;  %1205 = vmatpush1.xpose.msra.mxu1 %v1343_v9 }
 0x391   : > { %942 = vmatprep.subr.mxu0 %v1345_v10  ;;  %1190 = vmatprep.subr.mxu1 %v1345_v10 }
 0x394   : > { %943 = vmatpush1.xpose.msra.mxu0 %v1347_v29  ;;  %1206 = vmatpush1.xpose.msra.mxu1 %v1347_v29 }
 0x395   : > { %944 = vmatprep.subr.mxu0 %v1349_v11  ;;  %1191 = vmatprep.subr.mxu1 %v1349_v11 }
 0x398   : > { %945 = vmatpush1.xpose.msra.mxu0 %v1351_v28  ;;  %1207 = vmatpush1.xpose.msra.mxu1 %v1351_v28 }
 0x399   : > { %946 = vmatprep.subr.mxu0 %v1353_v47  ;;  %1192 = vmatprep.subr.mxu1 %v1353_v47 }
 0x39c   : > { %947 = vmatpush1.xpose.msra.mxu0 %v1355_v12  ;;  %1208 = vmatpush1.xpose.msra.mxu1 %v1355_v12 }
 0x39d   : > { %948 = vmatprep.subr.mxu0 %v1357_v13  ;;  %1193 = vmatprep.subr.mxu1 %v1357_v13 }
 0x3a0   : > { %949 = vmatpush1.xpose.msra.mxu0 %v1359_v14  ;;  %1209 = vmatpush1.xpose.msra.mxu1 %v1359_v14 }
 0x3a1   : > { %950 = vmatprep.subr.mxu0 %v1361_v46  ;;  %1194 = vmatprep.subr.mxu1 %v1361_v46 }
 0x3a4   : > { %951 = vmatpush1.xpose.msra.mxu0 %v1363_v15  ;;  %1210 = vmatpush1.xpose.msra.mxu1 %v1363_v15 }
 0x3a7   : > { %990 = vmatmul.mubr.f32.vlgmr.msra.gmra.mxu1 %v916_v45  ;;  %985 = vmatmul.mubr.f32.vlgmr.msra.gmra.mxu0 %v914_v16 }
 0x3a8   : > { %994 = vmatprep.mubr.f32.mxu1 %v919_v17 }
 0x3ab   : > { %995 = vmatmul.mubr.f32.gmra.mxu1 %v918_v18 }
 0x467   : > { %v991_v44 = vpop.f32.mrf.mxu1  ;;  %v986_v19 = vpop.f32.mrf.mxu0 }
 0x469   : > { %v993_v20 = vpop.f32.mrf.mxu1  ;;  %v988_v21 = vpop.f32.mrf.mxu0 }
 0x46b   : > { %v996_v43 = vpop.f32.mrf.mxu1 }
 0x46c   : > { %1364 = vrcp.f32 %v996_v43 }
 0x46d   : > { %v998_v22 = vpop.f32.mrf.mxu1 }
 0x479   : > { %v1365_v25 = vpop.eup %1364 }
 0x47a   : > { %v1004_v26 = vrot.slane %v1365_v25, %v1003_v42 }
 0x47c   : > { %v1005_v27 = vmul.f32 %v1004_v26, %v986_v19  ;;  %v1006_v56 = vmul.f32 %v1004_v26, %v991_v44 }
 0x47e   : > { %v1009_v62 = vmul.f32 %v1008_v41, %v1005_v27  ;;  %v1010_v60 = vmul.f32 %v1008_v41, %v1006_v56 }
 0x480   : > { %v1013_v39 = vadd.f32 %v1011_v40, %v1009_v62  ;;  %v1014_v61 = vadd.f32 %v1012_v59, %v1010_v60 }
 0x482   : > { %1015 = vst [vmem:[%s1649_s12] sm:$0xff] %v1013_v39  ;;  %1016 = vst [vmem:[%s1649_s12 + $0x8] sm:$0xff] %v1014_v61 }
 0x483   : > { %1407 = shalt.err (!%p1404_p11)
}
 0x484   : > { %s1408_s12 = scalar_lea.hbm %s1870_s24, 256  ;;  %s1412_s4 = scalar_lea.hbm %s1932_s5, 1024 }
 0x485   : > { %p1409_p3 = scmp.ne.s32.totalorder %s1870_s24, %s1408_s12  ;;  %p1413_p0 = scmp.lt.s32.totalorder %s1870_s24, %s1932_s5 }
 0x486   : > { %p1414_p2 = scmp.lt.s32.totalorder %s1412_s4, %s1408_s12 }
 0x487   : > { %p1410_p13 = pnand %p1409_p3, %p1601_p9 }
 0x488   : > { %p1415_p8 = por %p1414_p2, %p1413_p0 }
 0x489   : > { %p1411_p1 = pneg %p1410_p13 }
 0x48b   : > { %p1416_p4 = pnand %p1415_p8, %p1411_p1 }
 0x48d   : > { %1419 = shalt.err (!%p1416_p4)
}
 0x48e   : > { %s1500_s11 = smov 128   ;;  %s1501_s6 = smov 256  }
 0x48f   : > { %s1502_s16 = smov 8  }
 0x490   : > { %1213 = dma.vmem_to_hbm [thread:$0]  (%p1601_p9), %s1872_s9, 256, %s1870_s24, %s1018_s23, %s1500_s11, %s1501_s6, %s1502_s16  }
 0x491 PF: > { %s1944_s17 = sld [smem:[#allocation12_spill]]  ;;  %p1224_p5 = scmp.ge.s32.totalorder %s1490_s27, 2 }
 0x493   : > { %p1220_p6 = pnand %p1224_p5, %p1607_p12 }
 0x495   : > { %p1221_p7 = pneg %p1220_p6 }
 0x497   : > { %s1047_s20 = sand.u32 1, %s1944_s17  }
 0x498   : > { %s1048_s19 = scalar_lea.sflag [#allocation8], %s1047_s20 }
 0x499   : > { %1457 = dma.done.wait (%p1221_p7), %s1048_s19, 256  }
 0x49a   : > { %1459 = vsyncadd (%p1221_p7), %s1048_s19, 4294967040  ;;  %s22_s27 = sadd.s32 1, %s1490_s27   ;;  %s1945_s10 = sld [smem:[#allocation13_spill]] }
 0x49b   : > { %p19_p10 = scmp.ge.s32.totalorder %s22_s27, 6   ;;  %s1946_s8 = sld [smem:[#allocation14_spill]] }
 0x49c   : > { %s1947_s20 = smov %s1466_s21  ;;  %s1948_s21 = smov %s1470_s22 }
 0x49d   : > { %s1949_s22 = smov %s1614_s15  ;;  %s1950_s23 = smov %s1482_s25 }
 0x49e   : > { %s1951_s24 = smov %s1486_s26  ;;  %21 = sbr.rel (!%p19_p10) target bundleno = 9 (0x9), region = 93 }
 0x4a0   : > { %s1952_s25 = smov %s1945_s10 }
 0x4a1   : > { %s1953_s26 = smov %s1946_s8 }
 0x4a3   :  { %1053 = vsyncpa [#allocation7], 1 }
 0x4a4   :  { %1055 = vsyncpa [#allocation7 + $0x1], 1 }
 0x4a5   :  { %1056 = vsyncpa [#allocation8], 1 }
 0x4a6   :  { %1058 = vsyncpa [#allocation8 + $0x1], 1 }

</bundles_post_ra>
